<compile_context>
chip_gen: v5e
topology: v5e:2x2
jax: 0.10.0
libtpu: 0.0.40
codegen_flags: <defaults>
</compile_context>

<pallas_src>
import jax
import jax.numpy as jnp
from jax.experimental import pallas as pl
from jax.experimental.pallas import tpu as pltpu


_NEG_BIG = -1e30  # padded vocab columns / accumulator init: exp() underflows to 0


def _round_up(a, b):
    return (a + b - 1) // b * b


def _sublane(dtype):
    return {4: 8, 2: 16, 1: 32}[jnp.dtype(dtype).itemsize]


def _stats_kernel(x_ref, w_ref, b_ref, stats_ref, m_sc, l_sc):
    """Pass 1: online logsumexp. grid = (nv, nr), vocab OUTER (reduction)."""
    j = pl.program_id(0)   # vocab tile (reduction axis, outer -> weight DMA'd once)
    i = pl.program_id(1)   # row tile

    @pl.when(j == 0)
    def _init():
        m_sc[i] = jnp.full(m_sc.shape[1:], _NEG_BIG, dtype=m_sc.dtype)
        l_sc[i] = jnp.zeros(l_sc.shape[1:], dtype=l_sc.dtype)

    logits = jnp.dot(x_ref[...], w_ref[...],
                     preferred_element_type=jnp.float32) + b_ref[...]

    # Per-lane (tm, 128) online max / sum-exp: the per-step work stays on the
    # VPU/EUP (no cross-lane XLU reductions competing with MXU pushes).
    n_groups = logits.shape[1] // 128
    m_tile = logits[:, 0:128]
    for g in range(1, n_groups):
        m_tile = jnp.maximum(m_tile, logits[:, g * 128:(g + 1) * 128])

    m_prev = m_sc[i]
    m_new = jnp.maximum(m_prev, m_tile)

    p_sum = jnp.exp(logits[:, 0:128] - m_new)
    for g in range(1, n_groups):
        p_sum = p_sum + jnp.exp(logits[:, g * 128:(g + 1) * 128] - m_new)

    l_sc[i] = l_sc[i] * jnp.exp(m_prev - m_new) + p_sum
    m_sc[i] = m_new

    @pl.when(j == pl.num_programs(0) - 1)
    def _finalize():
        # Single cross-lane merge per row tile: stats = m + log(l).
        m_lane = m_sc[i]
        l_lane = l_sc[i]
        m_row = jnp.max(m_lane, axis=-1, keepdims=True)
        l_row = jnp.sum(l_lane * jnp.exp(m_lane - m_row), axis=-1, keepdims=True)
        stats_ref[...] = m_row + jnp.log(l_row)


def _write_kernel(x_ref, w_ref, b_ref, stats_ref, o_ref):
    """Pass 2: o = (x @ w_tile + b_tile) - logsumexp (recompute logits tile)."""
    logits = jnp.dot(x_ref[...], w_ref[...],
                     preferred_element_type=jnp.float32) + b_ref[...]
    o_ref[...] = (logits - stats_ref[...]).astype(o_ref.dtype)


def prepare_generator_params(w, b, *, tv=2048, matmul_dtype=jnp.bfloat16):
    """One-time weight preparation (do this at module init, NOT per forward).

    Pads the vocab axis to a multiple of the vocab tile and casts the weight to
    the matmul dtype once, so the per-step forward never re-reads/re-writes the
    full (d_model, vocab) weight through HBM just to pad/cast it.

    w: (d_model, vocab)   nn.Linear weight, transposed vs. PyTorch layout
    b: (vocab,)           nn.Linear bias
    """
    d_model, vocab = w.shape
    tv_eff = _round_up(min(tv, _round_up(vocab, 128)), 128)
    vp = _round_up(vocab, tv_eff)

    wp = w
    bp = b.astype(jnp.float32).reshape(1, vocab)
    if vp != vocab:
        wp = jnp.pad(wp, ((0, 0), (0, vp - vocab)))
        # padded columns get a huge negative bias -> exp() underflows to zero
        bp = jnp.pad(bp, ((0, 0), (0, vp - vocab)), constant_values=_NEG_BIG)
    if matmul_dtype is not None:
        wp = wp.astype(matmul_dtype)

    return {
        "w": wp,                       # (d_model, vp), matmul dtype
        "b": bp,                       # (1, vp), f32
        "vocab": vocab,
        "tv": tv_eff,
        "matmul_dtype": None if matmul_dtype is None else jnp.dtype(matmul_dtype),
    }


def generator_forward(x, params, *, tm=512, out_dtype=None,
                      vmem_limit_bytes=48 * 1024 * 1024):
    """log_softmax(x @ w + b, axis=-1).

    x: (batch, seq, d_model) activations; params: from prepare_generator_params.
    """
    wp, bp = params["w"], params["b"]
    vocab, tv_eff = params["vocab"], params["tv"]
    matmul_dtype = params["matmul_dtype"]

    batch, seq, d_model = x.shape
    assert wp.shape[0] == d_model
    vp = wp.shape[1]
    nv = vp // tv_eff
    out_dtype = x.dtype if out_dtype is None else jnp.dtype(out_dtype)
    M = batch * seq

    # ---- row tile, aligned to the (sublane, 128-lane) vreg layout ----
    kdt = jnp.dtype(x.dtype) if matmul_dtype is None else matmul_dtype
    sub = max(8, _sublane(kdt), _sublane(out_dtype))
    tm_eff = _round_up(min(tm, _round_up(M, sub)), sub)
    mp = _round_up(M, tm_eff)
    nr = mp // tm_eff

    # ---- flatten + (cheap) row pad of the activations only ----
    x2 = x.reshape(M, d_model)
    if mp != M:
        x2 = jnp.pad(x2, ((0, mp - M), (0, 0)))
    if matmul_dtype is not None:
        x2 = x2.astype(matmul_dtype)

    # ---- pass 1: per-row logsumexp stats.  Vocab axis OUTER so the weight is
    #      streamed from HBM exactly once; per-row running max/sum-exp live in
    #      persistent per-lane VMEM scratch indexed by the row-tile id. ----
    # NOTE: persistent scratch is ~1 KiB per row (2 x f32 x 128 lanes); for very
    # large M chunk the rows in the caller if this approaches the VMEM budget.
    stats = pl.pallas_call(
        _stats_kernel,
        out_shape=jax.ShapeDtypeStruct((mp, 1), jnp.float32),
        grid_spec=pltpu.PrefetchScalarGridSpec(
            num_scalar_prefetch=0,
            grid=(nv, nr),
            in_specs=[
                pl.BlockSpec((tm_eff, d_model), lambda j, i: (i, 0)),
                pl.BlockSpec((d_model, tv_eff), lambda j, i: (0, j)),
                pl.BlockSpec((1, tv_eff), lambda j, i: (0, j)),
            ],
            out_specs=pl.BlockSpec((tm_eff, 1), lambda j, i: (i, 0)),
            scratch_shapes=[pltpu.VMEM((nr, tm_eff, 128), jnp.float32),
                            pltpu.VMEM((nr, tm_eff, 128), jnp.float32)],
        ),
        compiler_params=pltpu.CompilerParams(
            dimension_semantics=("arbitrary", "arbitrary"),
            vmem_limit_bytes=vmem_limit_bytes),
    )(x2, wp, bp)

    # ---- pass 2: write normalized logits.  Vocab axis OUTER and marked
    #      "parallel" so v7x megacore shards vocab tiles across its 2 cores
    #      (weight tile still DMA'd once per core-local vocab tile); inner row
    #      axis is sequential so the weight tile stays VMEM-resident. ----
    out2 = pl.pallas_call(
        _write_kernel,
        out_shape=jax.ShapeDtypeStruct((mp, vp), out_dtype),
        grid_spec=pltpu.PrefetchScalarGridSpec(
            num_scalar_prefetch=0,
            grid=(nv, nr),
            in_specs=[
                pl.BlockSpec((tm_eff, d_model), lambda j, i: (i, 0)),
                pl.BlockSpec((d_model, tv_eff), lambda j, i: (0, j)),
                pl.BlockSpec((1, tv_eff), lambda j, i: (0, j)),
                pl.BlockSpec((tm_eff, 1), lambda j, i: (i, 0)),
            ],
            out_specs=pl.BlockSpec((tm_eff, tv_eff), lambda j, i: (i, j)),
        ),
        compiler_params=pltpu.CompilerParams(
            dimension_semantics=("parallel", "arbitrary"),
            vmem_limit_bytes=vmem_limit_bytes),
    )(x2, wp, bp, stats)

    # padded vocab columns come out as ~(-1e30 - lse); they are sliced off here
    # (do not reuse the padded (mp, vp) buffer directly).
    out2 = out2[:M, :vocab]
    return out2.reshape(batch, seq, vocab)


if __name__ == "__main__":
    key = jax.random.PRNGKey(0)
    kx, kw, kb = jax.random.split(key, 3)

    # Config 1: f32 matmul path; exercises multi-vocab-tile online logsumexp
    # (nv=2 vocab tiles, 2 lane-groups per tile), single row tile.
    batch, seq, d_model, vocab = 2, 8, 32, 512
    x = jax.random.normal(kx, (batch, seq, d_model), dtype=jnp.float32)
    w = jax.random.normal(kw, (d_model, vocab), dtype=jnp.float32) * 0.02
    b = jax.random.normal(kb, (vocab,), dtype=jnp.float32) * 0.02

    params = prepare_generator_params(w, b, tv=256, matmul_dtype=None)
    out = jax.block_until_ready(generator_forward(x, params))
    ref = jax.nn.log_softmax(jnp.einsum("bsd,dv->bsv", x, w) + b, axis=-1)
    assert out.shape == (batch, seq, vocab)
    err = float(jnp.max(jnp.abs(out - ref)))
    assert err < 1e-4, err

    # Config 2: default bf16 matmul (f32 accumulation); exercises row/vocab
    # padding and a 3x3 (vocab x row) grid with persistent per-row-tile scratch.
    b2, s2, d2, v2 = 2, 20, 32, 300
    xb = jax.random.normal(kx, (b2, s2, d2), dtype=jnp.float32)
    wb = jax.random.normal(kw, (d2, v2), dtype=jnp.float32) * 0.02
    bb = jax.random.normal(kb, (v2,), dtype=jnp.float32) * 0.02

    params_b = prepare_generator_params(wb, bb, tv=128)   # bf16 matmul default
    out_b = jax.block_until_ready(generator_forward(xb, params_b, tm=16))
    ref_b = jax.nn.log_softmax(jnp.einsum("bsd,dv->bsv", xb, wb) + bb, axis=-1)
    assert out_b.shape == (b2, s2, v2)
    err_b = float(jnp.max(jnp.abs(out_b - ref_b)))
    assert err_b < 1e-2, err_b

    print("KERNEL_OK")
</pallas_src>

<mosaic_0001>
module attributes {stable_mosaic.version = 11 : i64} {
  func.func @_stats_kernel(%arg0: i32, %arg1: i32, %arg2: memref<16x32xf32, #tpu.memory_space<vmem>>, %arg3: memref<32x256xf32, #tpu.memory_space<vmem>>, %arg4: memref<1x256xf32, #tpu.memory_space<vmem>>, %arg5: memref<16x1xf32, #tpu.memory_space<vmem>>, %arg6: memref<1x16x128xf32, #tpu.memory_space<vmem>>, %arg7: memref<1x16x128xf32, #tpu.memory_space<vmem>>) attributes {dimension_semantics = [#tpu.dimension_semantics<arbitrary>, #tpu.dimension_semantics<arbitrary>], iteration_bounds = array<i64: 2, 1>, scalar_prefetch = 0 : i64, scratch_operands = 2 : i64, tpu.core_type = #tpu.core_type<tc>, window_params = [{transform_indices = @transform_0, window_bounds = array<i64: 16, 32>}, {transform_indices = @transform_1, window_bounds = array<i64: 32, 256>}, {transform_indices = @transform_2, window_bounds = array<i64: 1, 256>}, {transform_indices = @transform_3, window_bounds = array<i64: 16, 1>}]} {
    %c0_i32 = arith.constant 0 : i32
    %0 = arith.cmpi eq, %arg0, %c0_i32 : i32
    %1 = arith.extui %0 : i1 to i32
    %c0_i32_0 = arith.constant 0 : i32
    %2 = arith.cmpi ne, %1, %c0_i32_0 : i32
    scf.if %2 {
      %cst_15 = arith.constant -1.000000e+30 : f32
      %41 = vector.broadcast %cst_15 : f32 to vector<16x128xf32>
      %42 = arith.index_cast %arg1 : i32 to index
      %c0_16 = arith.constant 0 : index
      %c0_17 = arith.constant 0 : index
      %43 = vector.load %arg6[%42, %c0_16, %c0_17] : memref<1x16x128xf32, #tpu.memory_space<vmem>>, vector<1x16x128xf32>
      %44 = vector.shape_cast %43 : vector<1x16x128xf32> to vector<16x128xf32>
      %45 = vector.shape_cast %41 : vector<16x128xf32> to vector<1x16x128xf32>
      tpu.vector_store %arg6[%42, %c0_16, %c0_17], %45 {strides = array<i32>} : memref<1x16x128xf32, #tpu.memory_space<vmem>>, vector<1x16x128xf32>,
      %cst_18 = arith.constant 0.000000e+00 : f32
      %46 = vector.broadcast %cst_18 : f32 to vector<16x128xf32>
      %47 = arith.index_cast %arg1 : i32 to index
      %c0_19 = arith.constant 0 : index
      %c0_20 = arith.constant 0 : index
      %48 = vector.load %arg7[%47, %c0_19, %c0_20] : memref<1x16x128xf32, #tpu.memory_space<vmem>>, vector<1x16x128xf32>
      %49 = vector.shape_cast %48 : vector<1x16x128xf32> to vector<16x128xf32>
      %50 = vector.shape_cast %46 : vector<16x128xf32> to vector<1x16x128xf32>
      tpu.vector_store %arg7[%47, %c0_19, %c0_20], %50 {strides = array<i32>} : memref<1x16x128xf32, #tpu.memory_space<vmem>>, vector<1x16x128xf32>,
    } else {
    }
    %c0 = arith.constant 0 : index
    %c0_1 = arith.constant 0 : index
    %3 = vector.load %arg2[%c0, %c0_1] : memref<16x32xf32, #tpu.memory_space<vmem>>, vector<16x32xf32>
    %c0_2 = arith.constant 0 : index
    %c0_3 = arith.constant 0 : index
    %4 = vector.load %arg3[%c0_2, %c0_3] : memref<32x256xf32, #tpu.memory_space<vmem>>, vector<32x256xf32>
    %cst = arith.constant dense<0.000000e+00> : vector<16x256xf32>
    %5 = tpu.matmul %3, %4, %cst {dimension_numbers = #tpu.dot_dimension_numbers<[1], [0], [0], [1], [0, 0, 1, 1], [], []>} : vector<16x32xf32>, vector<32x256xf32>, vector<16x256xf32> -> vector<16x256xf32>
    %c0_4 = arith.constant 0 : index
    %c0_5 = arith.constant 0 : index
    %6 = vector.load %arg4[%c0_4, %c0_5] : memref<1x256xf32, #tpu.memory_space<vmem>>, vector<1x256xf32>
    %7 = vector.broadcast %6 : vector<1x256xf32> to vector<16x256xf32>
    %8 = arith.addf %5, %7 : vector<16x256xf32>
    %9 = vector.extract_strided_slice %8 {offsets = [0, 0], sizes = [16, 128], strides = [1, 1]} : vector<16x256xf32> to vector<16x128xf32>
    %10 = vector.extract_strided_slice %8 {offsets = [0, 128], sizes = [16, 128], strides = [1, 1]} : vector<16x256xf32> to vector<16x128xf32>
    %11 = arith.maximumf %9, %10 : vector<16x128xf32>
    %12 = arith.index_cast %arg1 : i32 to index
    %c0_6 = arith.constant 0 : index
    %c0_7 = arith.constant 0 : index
    %13 = vector.load %arg6[%12, %c0_6, %c0_7] : memref<1x16x128xf32, #tpu.memory_space<vmem>>, vector<1x16x128xf32>
    %14 = vector.shape_cast %13 : vector<1x16x128xf32> to vector<16x128xf32>
    %15 = arith.maximumf %14, %11 : vector<16x128xf32>
    %16 = vector.extract_strided_slice %8 {offsets = [0, 0], sizes = [16, 128], strides = [1, 1]} : vector<16x256xf32> to vector<16x128xf32>
    %17 = arith.subf %16, %15 : vector<16x128xf32>
    %18 = math.exp %17 : vector<16x128xf32>
    %19 = vector.extract_strided_slice %8 {offsets = [0, 128], sizes = [16, 128], strides = [1, 1]} : vector<16x256xf32> to vector<16x128xf32>
    %20 = arith.subf %19, %15 : vector<16x128xf32>
    %21 = math.exp %20 : vector<16x128xf32>
    %22 = arith.addf %18, %21 : vector<16x128xf32>
    %23 = arith.index_cast %arg1 : i32 to index
    %c0_8 = arith.constant 0 : index
    %c0_9 = arith.constant 0 : index
    %24 = vector.load %arg7[%23, %c0_8, %c0_9] : memref<1x16x128xf32, #tpu.memory_space<vmem>>, vector<1x16x128xf32>
    %25 = vector.shape_cast %24 : vector<1x16x128xf32> to vector<16x128xf32>
    %26 = arith.subf %14, %15 : vector<16x128xf32>
    %27 = math.exp %26 : vector<16x128xf32>
    %28 = arith.mulf %25, %27 : vector<16x128xf32>
    %29 = arith.addf %28, %22 : vector<16x128xf32>
    %30 = arith.index_cast %arg1 : i32 to index
    %c0_10 = arith.constant 0 : index
    %c0_11 = arith.constant 0 : index
    %31 = vector.load %arg7[%30, %c0_10, %c0_11] : memref<1x16x128xf32, #tpu.memory_space<vmem>>, vector<1x16x128xf32>
    %32 = vector.shape_cast %31 : vector<1x16x128xf32> to vector<16x128xf32>
    %33 = vector.shape_cast %29 : vector<16x128xf32> to vector<1x16x128xf32>
    tpu.vector_store %arg7[%30, %c0_10, %c0_11], %33 {strides = array<i32>} : memref<1x16x128xf32, #tpu.memory_space<vmem>>, vector<1x16x128xf32>,
    %34 = arith.index_cast %arg1 : i32 to index
    %c0_12 = arith.constant 0 : index
    %c0_13 = arith.constant 0 : index
    %35 = vector.load %arg6[%34, %c0_12, %c0_13] : memref<1x16x128xf32, #tpu.memory_space<vmem>>, vector<1x16x128xf32>
    %36 = vector.shape_cast %35 : vector<1x16x128xf32> to vector<16x128xf32>
    %37 = vector.shape_cast %15 : vector<16x128xf32> to vector<1x16x128xf32>
    tpu.vector_store %arg6[%34, %c0_12, %c0_13], %37 {strides = array<i32>} : memref<1x16x128xf32, #tpu.memory_space<vmem>>, vector<1x16x128xf32>,
    %c1_i32 = arith.constant 1 : i32
    %38 = arith.cmpi eq, %arg0, %c1_i32 : i32
    %39 = arith.extui %38 : i1 to i32
    %c0_i32_14 = arith.constant 0 : i32
    %40 = arith.cmpi ne, %39, %c0_i32_14 : i32
    scf.if %40 {
      %41 = arith.index_cast %arg1 : i32 to index
      %c0_15 = arith.constant 0 : index
      %c0_16 = arith.constant 0 : index
      %42 = vector.load %arg6[%41, %c0_15, %c0_16] : memref<1x16x128xf32, #tpu.memory_space<vmem>>, vector<1x16x128xf32>
      %43 = vector.shape_cast %42 : vector<1x16x128xf32> to vector<16x128xf32>
      %44 = arith.index_cast %arg1 : i32 to index
      %c0_17 = arith.constant 0 : index
      %c0_18 = arith.constant 0 : index
      %45 = vector.load %arg7[%44, %c0_17, %c0_18] : memref<1x16x128xf32, #tpu.memory_space<vmem>>, vector<1x16x128xf32>
      %46 = vector.shape_cast %45 : vector<1x16x128xf32> to vector<16x128xf32>
      %cst_19 = arith.constant dense<0xFF800000> : vector<16xf32>
      %47 = vector.multi_reduction <maximumf>, %43, %cst_19 [1] : vector<16x128xf32> to vector<16xf32>
      %48 = vector.shape_cast %47 : vector<16xf32> to vector<16x1xf32>
      %49 = vector.broadcast %48 : vector<16x1xf32> to vector<16x128xf32>
      %50 = arith.subf %43, %49 : vector<16x128xf32>
      %51 = math.exp %50 : vector<16x128xf32>
      %52 = arith.mulf %46, %51 : vector<16x128xf32>
      %cst_20 = arith.constant dense<0.000000e+00> : vector<16xf32>
      %53 = vector.multi_reduction <add>, %52, %cst_20 [1] : vector<16x128xf32> to vector<16xf32>
      %54 = vector.shape_cast %53 : vector<16xf32> to vector<16x1xf32>
      %55 = math.log %54 : vector<16x1xf32>
      %56 = arith.addf %48, %55 : vector<16x1xf32>
      %c0_21 = arith.constant 0 : index
      %c0_22 = arith.constant 0 : index
      %57 = vector.load %arg5[%c0_21, %c0_22] : memref<16x1xf32, #tpu.memory_space<vmem>>, vector<16x1xf32>
      tpu.vector_store %arg5[%c0_21, %c0_22], %56 {strides = array<i32>} : memref<16x1xf32, #tpu.memory_space<vmem>>, vector<16x1xf32>,
    } else {
    }
    return
  }
  func.func @transform_0(%arg0: i32, %arg1: i32) -> (i32, i32) {
    %c0_i32 = arith.constant 0 : i32
    %c0_i32_0 = arith.constant 0 : i32
    return %arg1, %c0_i32 : i32, i32
  }
  func.func @transform_1(%arg0: i32, %arg1: i32) -> (i32, i32) {
    %c0_i32 = arith.constant 0 : i32
    %c0_i32_0 = arith.constant 0 : i32
    return %c0_i32, %arg0 : i32, i32
  }
  func.func @transform_2(%arg0: i32, %arg1: i32) -> (i32, i32) {
    %c0_i32 = arith.constant 0 : i32
    %c0_i32_0 = arith.constant 0 : i32
    return %c0_i32, %arg0 : i32, i32
  }
  func.func @transform_3(%arg0: i32, %arg1: i32) -> (i32, i32) {
    %c0_i32 = arith.constant 0 : i32
    %c0_i32_0 = arith.constant 0 : i32
    return %arg1, %c0_i32 : i32, i32
  }
}

</mosaic_0001>

<bundles_post_ra>
// kernel: tpu_custom_call.1
= control target key start
LH: loop header
LB: loop body
LE: loop exit
PB: predicated region body
PF: predicated region fallthrough
CT: control target
= control target key end

     0   :  { %8 = vsyncpa [#allocation5], 0  ;;  %s982_s0 = inlined_call_operand.hbm [shape: f32[16,32], index: 0, kind: input, shape index: {}]   ;;  %s983_s1 = inlined_call_operand.hbm [shape: f32[32,512], index: 1, kind: input, shape index: {}]   ;;  %s984_s2 = inlined_call_operand.hbm [shape: f32[1,512], index: 2, kind: input, shape index: {}]   ;;  %s985_s3 = inlined_call_operand.vmem [shape: f32[16,1], index: 3, kind: output, shape index: {}]  }
   0x1   :  { %9 = vsyncpa [#allocation7], 0 }
   0x2   :  { %11 = vsyncpa [#allocation7 + $0x1], 0  ;;  %s841_s12 = smov 0   ;;  %s843_s13 = smov 0  }
   0x3   :  { %s845_s14 = smov 0   ;;  %s847_s15 = smov 0  }
   0x4   :  { %s849_s16 = smov 0   ;;  %s851_s17 = smov 0  }
   0x5 LB: > { %s29_s18 = sadd.s32 1, %s807_s16  ;;  %s62_s19 = sadd.s32 1, %s799_s14  ;;  %s811_s17 = sphi %s851_s17, %s17_s17   ;;  %s807_s16 = sphi %s849_s16, %s995_s16   ;;  %s803_s15 = sphi %s847_s15, %s994_s15   ;;  %s799_s14 = sphi %s845_s14, %s993_s14   ;;  %s795_s13 = sphi %s843_s13, %s992_s13   ;;  %s791_s12 = sphi %s841_s12, %s991_s12  }
   0x6   : > { %p31_p0 = scmp.ge.s32.totalorder %s29_s18, 2  ;;  %p69_p1 = scmp.ne.s32.totalorder %s799_s14, %s795_s13 }
   0x7   : > { %p70_p2 = scmp.eq.s32.totalorder %s811_s17, 0  ;;  %p589_p4 = scmp.lt.s32.totalorder %s811_s17, 2 }
   0x8   : > { %s997_s18 = smov (%p31_p0, %s29_s18), 0  ;;  %s168_s22 = sand.u32 1, %s811_s17  }
   0x9   : > { %p878_p3 = por %p70_p2, %p69_p1  ;;  %s59_s21 = ssub.s32 %s807_s16, %s997_s18 }
   0xa   : > { %p60_p5 = scmp.eq.s32.totalorder %s59_s21, 0  ;;  %s170_s23 = sand.u32 1, %s799_s14  }
   0xb   : > { %s560_s24 = sshll.u32 %s807_s16, 4  ;;  %s541_s26 = sshll.u32 %s170_s23, 6 }
   0xc   : > { %s889_s25 = scalar_select %p60_p5, %s799_s14, %s62_s19  }
   0xd   : > { %s177_s29 = scalar_lea.hbm %s983_s1, %s560_s24  ;;  %s172_s4 = scalar_lea.vmem [#allocation6], %s541_s26 }
   0xe   : > { %s178_s30 = sshll.u32 %s177_s29, 4  ;;  %s180_s5 = sshll.u32 %s172_s4, 4  ;;  %s179_s30 = int_to_ptr.hbm [resolvable:$true] %s178_s30  ;;  %s181_s5 = int_to_ptr.vmem [resolvable:$true] %s180_s5 }
   0xf   : > { %p898_p6 = pnand %p589_p4, %p878_p3  ;;  %s902_s7 = scalar_lea.sflag [#allocation7], %s168_s22 }
  0x10   : > { %s813_s8 = smov 512   ;;  %s814_s9 = smov 256  }
  0x11   : > { %s815_s10 = smov 16   ;;  %s537_s11 = sadd.s32 4294967295, %s811_s17  }
  0x12   : > { %584 = dma.hbm_to_vmem [thread:$0]  (!%p898_p6), %s179_s30, 1024, %s181_s5, %s902_s7, %s813_s8, %s814_s9, %s815_s10  }
  0x13   : > { %p75_p7 = scmp.ne.s32.totalorder %s795_s13, %s791_s12  ;;  %p910_p8 = scmp.eq.s32.totalorder %s537_s11, 0 }
  0x14   : > { %p538_p9 = scmp.ge.s32.totalorder %s811_s17, 1  ;;  %p138_p10 = scmp.lt.s32.totalorder %s811_s17, 3 }
  0x15   : > { %p918_p11 = por %p910_p8, %p75_p7  ;;  %s152_s24 = sshll.u32 %s982_s0, 4  ;;  %s153_s24 = int_to_ptr.hbm [resolvable:$true] %s152_s24 }
  0x16   : > { %p925_p12 = pnand %p538_p9, %p138_p10  ;;  %s816_s12 = smov [#allocation4]  }
  0x17   : > { %s154_s27 = sshll.u32 %s816_s12, 4  ;;  %s544_s28 = sshll.u32 %s170_s23, 1  ;;  %s155_s27 = int_to_ptr.vmem [resolvable:$true] %s154_s27 }
  0x18   : > { %p577_p13 = pneg %p925_p12  ;;  %s545_s29 = sshll.u32 %s807_s16, 1 }
  0x19   : > { %s198_s5 = scalar_lea.hbm %s984_s2, %s545_s29  ;;  %s817_s8 = smov 128  }
  0x1a   : > { %p578_p0 = pnand %p577_p13, %p910_p8  ;;  %s818_s9 = smov 8  }
  0x1b   : > { %s200_s10 = sshll.u32 %s198_s5, 4  ;;  %s194_s21 = scalar_lea.vmem [#allocation8], %s544_s28  ;;  %s201_s10 = int_to_ptr.hbm [resolvable:$true] %s200_s10 }
  0x1c   : > { %580 = dma.hbm_to_vmem [thread:$0]  (!%p578_p0), %s153_s24, 256, %s155_s27, [#allocation5], %s817_s8, %s817_s8, %s818_s9  }
  0x1d   : > { %s202_s22 = sshll.u32 %s194_s21, 4  ;;  %211 = sbr.rel (%p925_p12) target bundleno = 481 (0x1e1), region = 32  ;;  %s203_s22 = int_to_ptr.vmem [resolvable:$true] %s202_s22 }
  0x1e   : > { %587 = dma.hbm_to_vmem [thread:$0]  (!%p898_p6), %s201_s10, 32, %s203_s22, %s902_s7  }
  0x22   : > { %782 = dma.done.wait (%p910_p8), [#allocation5], 256  }
  0x23   : > { %784 = vsyncadd (%p910_p8), [#allocation5], 4294967040  ;;  %s218_s23 = sand.u32 1, %s537_s11   ;;  %s220_s24 = sand.u32 1, %s795_s13  }
  0x24   : > { %s548_s12 = sshll.u32 %s220_s24, 6  ;;  %s219_s27 = scalar_lea.sflag [#allocation7], %s218_s23 }
  0x25   : > { %s222_s28 = scalar_lea.vmem [#allocation6], %s548_s12 }
  0x26   : > { %786 = dma.done.wait (%p918_p11), %s219_s27, 1056  }
  0x27   : > { %788 = vsyncadd (%p918_p11), %s219_s27, 4294966240  ;;  %s951_s6 = sshll.u32 %s220_s24, 1  ;;  %p550_p1 = scmp.ne.s32.totalorder %s803_s15, 0 }
  0x28   : > { %s232_s7 = scalar_lea.vmem [#allocation8], %s951_s6 }
  0x29   : > { %273 = sbr.rel (%p550_p1) target bundleno = 51 (0x33), region = 48 }
  0x2e   : > { %v819_v0 = vmov -1e+30   ;;  %v820_v1 = vmov 0.0  }
  0x2f   : > { %276 = vst [vmem:[#allocation2] sm:$0xff] %v819_v0 }
  0x30   : > { %277 = vst [vmem:[#allocation2 + $0x8] sm:$0xff] %v819_v0 }
  0x31   : > { %279 = vst [vmem:[#allocation3 + $0x8] sm:$0xff] %v820_v1 }
  0x32   : > { %280 = vst [vmem:[#allocation3] sm:$0xff] %v820_v1 }
  0x33 PF: > { %v289_v2 = vld [vmem:[%s222_s28 + $0x30] sm:$0xff]  ;;  %v290_v3 = vld [vmem:[%s222_s28 + $0x38] sm:$0xff]  ;;  %v287_v4 = vld [vmem:[%s222_s28 + $0x20] sm:$0xff]  ;;  %vm297_vm0 = vcmask 261120   ;;  %p555_p2 = scmp.ne.s32.totalorder %s803_s15, 1 }
  0x34   : > { %561 = vmatpush.msra.mxu2 %v289_v2  ;;  %565 = vmatpush.msra.mxu3 %v290_v3  ;;  %v288_v5 = vld [vmem:[%s222_s28 + $0x28] sm:$0xff]  ;;  %v285_v6 = vld [vmem:[%s222_s28 + $0x10] sm:$0xff]  ;;  %v286_v7 = vld [vmem:[%s222_s28 + $0x18] sm:$0xff] }
  0x35   : > { %316 = vmatpush.msra.mxu0 %v289_v2  ;;  %339 = vmatpush.msra.mxu1 %v290_v3  ;;  %v283_v8 = vld [vmem:[%s222_s28] sm:$0xff]  ;;  %v284_v9 = vld [vmem:[%s222_s28 + $0x8] sm:$0xff]  ;;  %v282_v10 = vld [vmem:[#allocation4 + $0x8] sm:$0xff] }
  0x36   : > { %562 = vmatpush.msra.mxu2 %v287_v4  ;;  %566 = vmatpush.msra.mxu3 %v288_v5  ;;  %v281_v11 = vld [vmem:[#allocation4] sm:$0xff]  ;;  %v291_v12 = vld [vmem:[%s232_s7] sm:$0x3] }
  0x37   : > { %317 = vmatpush.msra.mxu0 %v287_v4  ;;  %340 = vmatpush.msra.mxu1 %v288_v5  ;;  %v293_v13 = vperm.slane %v291_v12, 0  ;;  %v294_v14 = vperm.slane %v291_v12, 1  ;;  %v354_v19 = vld [vmem:[#allocation2] sm:$0xff]  ;;  %v355_v26 = vld [vmem:[#allocation2 + $0x8] sm:$0xff] }
  0x38   : > { %563 = vmatpush.msra.mxu2 %v285_v6  ;;  %567 = vmatpush.msra.mxu3 %v286_v7  ;;  %v373_v42 = vld [vmem:[#allocation3 + $0x8] sm:$0xff] }
  0x39   : > { %318 = vmatpush.msra.mxu0 %v285_v6  ;;  %341 = vmatpush.msra.mxu1 %v286_v7  ;;  %v374_v48 = vld [vmem:[#allocation3] sm:$0xff] }
  0x3a   : > { %564 = vmatpush.msra.mxu2 %v283_v8  ;;  %568 = vmatpush.msra.mxu3 %v284_v9 }
  0x3b   : > { %552 = vmatmul.msk.f32.vlgmr.msra.gmra.mxu2 %vm297_vm0, %v282_v10  ;;  %554 = vmatmul.msk.f32.vlgmr.msra.gmra.mxu3 %vm297_vm0, %v282_v10 }
  0x3c   : > { %319 = vmatpush.msra.mxu0 %v283_v8  ;;  %342 = vmatpush.msra.mxu1 %v284_v9 }
  0x3d   : > { %551 = vmatmul.msk.f32.vlgmr.msra.gmra.mxu0 %vm297_vm0, %v281_v11  ;;  %553 = vmatmul.msk.f32.vlgmr.msra.gmra.mxu1 %vm297_vm0, %v281_v11 }
  0xba   : > { %v321_v15 = vpop.f32.mrf.mxu0  ;;  %v344_v16 = vpop.f32.mrf.mxu1 }
  0xbb   : > { %v322_v17 = vadd.f32 %v321_v15, %v293_v13  ;;  %v345_v18 = vadd.f32 %v344_v16, %v294_v14 }
  0xbd   : > { %v350_v20 = vmax.f32 %v322_v17, %v345_v18 }
  0xbe   : > { %v324_v21 = vpop.f32.mrf.mxu2  ;;  %v347_v22 = vpop.f32.mrf.mxu3 }
  0xbf   : > { %v356_v23 = vmax.f32 %v354_v19, %v350_v20  ;;  %v325_v24 = vadd.f32 %v324_v21, %v293_v13  ;;  %v348_v25 = vadd.f32 %v347_v22, %v294_v14 }
  0xc1   : > { %v358_v27 = vsub.f32 %v322_v17, %v356_v23  ;;  %v364_v28 = vsub.f32 %v345_v18, %v356_v23  ;;  %v375_v29 = vsub.f32 %v354_v19, %v356_v23  ;;  %387 = vst [vmem:[#allocation2] sm:$0xff] %v356_v23  ;;  %v351_v30 = vmax.f32 %v325_v24, %v348_v25 }
  0xc3   : > { %v360_v31 = vmul.f32 1.442695, %v358_v27  ;;  %v366_v32 = vmul.f32 1.442695, %v364_v28  ;;  %v377_v33 = vmul.f32 1.442695, %v375_v29  ;;  %v357_v34 = vmax.f32 %v355_v26, %v351_v30 }
  0xc5   : > { %647 = vpow2.f32 %v360_v31  ;;  %v359_v35 = vsub.f32 %v325_v24, %v357_v34  ;;  %v365_v36 = vsub.f32 %v348_v25, %v357_v34  ;;  %v376_v37 = vsub.f32 %v355_v26, %v357_v34  ;;  %388 = vst [vmem:[#allocation2 + $0x8] sm:$0xff] %v357_v34 }
  0xc6   : > { %649 = vpow2.f32 %v366_v32 }
  0xc7   : > { %651 = vpow2.f32 %v377_v33  ;;  %v362_v38 = vmul.f32 1.442695, %v359_v35  ;;  %v368_v39 = vmul.f32 1.442695, %v365_v36  ;;  %v379_v40 = vmul.f32 1.442695, %v376_v37 }
  0xc9   : > { %653 = vpow2.f32 %v362_v38 }
  0xca   : > { %655 = vpow2.f32 %v368_v39 }
  0xcb   : > { %v648_v41 = vpop.eup %647  ;;  %657 = vpow2.f32 %v379_v40 }
  0xcc   : > { %v650_v43 = vpop.eup %649 }
  0xcd   : > { %v652_v44 = vpop.eup %651  ;;  %v370_v45 = vadd.f32 %v650_v43, %v648_v41 }
  0xce   : > { %v381_v46 = vmul.f32 %v652_v44, %v373_v42 }
  0xcf   : > { %v654_v47 = vpop.eup %653 }
  0xd0   : > { %v656_v49 = vpop.eup %655  ;;  %v383_v50 = vadd.f32 %v381_v46, %v370_v45 }
  0xd1   : > { %v658_v51 = vpop.eup %657  ;;  %v371_v52 = vadd.f32 %v656_v49, %v654_v47 }
  0xd2   : > { %385 = vst [vmem:[#allocation3 + $0x8] sm:$0xff] %v383_v50  ;;  %v382_v53 = vmul.f32 %v658_v51, %v374_v48  ;;  %392 = sbr.rel (%p555_p2) target bundleno = 481 (0x1e1), region = 52 }
  0xd4   : > { %v384_v54 = vadd.f32 %v382_v53, %v371_v52 }
  0xd6   : > { %386 = vst [vmem:[#allocation3] sm:$0xff] %v384_v54 }
  0xd7   : > { %v393_v55 = vld [vmem:[#allocation2] sm:$0xff]  ;;  %v394_v56 = vld [vmem:[#allocation2 + $0x8] sm:$0xff]  ;;  %vm419_vm1 = vcmask 7168  }
  0xd8   : > { %397 = vmax.xlane.f32.xlu0 %v393_v55 }
  0xd9   : > { %v395_v62 = vld [vmem:[#allocation3 + $0x8] sm:$0xff] }
  0xdd   : > { %v396_v2 = vld [vmem:[#allocation3] sm:$0xff] }
  0xe0   : > { %399 = vmax.xlane.f32.xlu0 %v394_v56 }
 0x14b   : > { %v398_v57 = vpop.xlane.xlu0 %397 }
 0x14c   : > { %v401_v58 = vsub.f32 %v393_v55, %v398_v57 }
 0x14e   : > { %v403_v59 = vmul.f32 1.442695, %v401_v58 }
 0x150   : > { %659 = vpow2.f32 %v403_v59 }
 0x153   : > { %v400_v60 = vpop.xlane.xlu0 %399 }
 0x154   : > { %v402_v61 = vsub.f32 %v394_v56, %v400_v60 }
 0x156   : > { %v660_v63 = vpop.eup %659  ;;  %v405_v0 = vmul.f32 1.442695, %v402_v61 }
 0x157   : > { %v407_v1 = vmul.f32 %v660_v63, %v395_v62 }
 0x158   : > { %661 = vpow2.f32 %v405_v0 }
 0x159   : > { %409 = vadd.xlane.f32.xlu1 %v407_v1 }
 0x15e   : > { %v662_v3 = vpop.eup %661 }
 0x15f   : > { %v408_v4 = vmul.f32 %v662_v3, %v396_v2 }
 0x161   : > { %411 = vadd.xlane.f32.xlu1 %v408_v4 }
 0x1cc   : > { %v410_v5 = vpop.xlane.xlu1 %409 }
 0x1cd   : > { %663 = vlog2.f32 %v410_v5 }
 0x1d3   : > { %v664_v6 = vpop.eup %663 }
 0x1d4   : > { %v414_v7 = vmul.f32 0.6931472, %v664_v6  ;;  %v412_v8 = vpop.xlane.xlu1 %411 }
 0x1d5   : > { %665 = vlog2.f32 %v412_v8 }
 0x1d6   : > { %v417_v9 = vadd.f32 %v414_v7, %v398_v57 }
 0x1d8   : > { %420 = vst.msk [vmem:[%s985_s3] sm:$0xff] %vm419_vm1, %v417_v9 }
 0x1db   : > { %v666_v10 = vpop.eup %665 }
 0x1dc   : > { %v416_v11 = vmul.f32 0.6931472, %v666_v10 }
 0x1de   : > { %v418_v12 = vadd.f32 %v416_v11, %v400_v60 }
 0x1e0   : > { %421 = vst.msk [vmem:[%s985_s3 + $0x8] sm:$0xff] %vm419_vm1, %v418_v12 }
 0x1e1 PF: > { %s17_s17 = sadd.s32 1, %s811_s17   ;;  %s991_s12 = smov %s795_s13 }
 0x1e2   : > { %p14_p3 = scmp.ge.s32.totalorder %s17_s17, 4   ;;  %s992_s13 = smov %s799_s14 }
 0x1e3   : > { %s993_s14 = smov %s889_s25  ;;  %s994_s15 = smov %s807_s16 }
 0x1e4   : > { %s995_s16 = smov %s997_s18  ;;  %16 = sbr.rel (!%p14_p3) target bundleno = 5 (0x5), region = 101 }
 0x1e9   :  { %444 = vsyncpa [#allocation5], 1 }
 0x1ea   :  { %446 = vsyncpa [#allocation5 + $0x1], 1 }
 0x1eb   :  { %447 = vsyncpa [#allocation7], 1 }
 0x1ec   :  { %449 = vsyncpa [#allocation7 + $0x1], 1 }

</bundles_post_ra>
